<compile_context>
chip_gen: v7x
topology: tpu7x:2x2x1
jax: 0.10.0
libtpu: 0.0.40
codegen_flags: <defaults>
</compile_context>

<pallas_src>
import jax
import jax.numpy as jnp
from jax.experimental import pallas as pl
from jax.experimental.pallas import tpu as pltpu

STYLE_DIM = 512        # fixed by Direction.weight = randn(512, motion_dim)
MAX_TILE_B = 1024      # batch tile (multiple of 8); ~4 MiB/step of wa+out,
                       # ~17 MiB double-buffered worst case -> fits scoped VMEM.
PALLAS_MIN_BATCH = 64  # below this, plain XLA fusion beats a standalone kernel


# ----------------------------- Pallas kernels ------------------------------

def _latent_single_kernel(wa_ref, a_ref, qT_ref, out_ref):
    # out = wa + alpha @ Q^T
    d = jnp.dot(a_ref[...].astype(jnp.float32),
                qT_ref[...].astype(jnp.float32),
                preferred_element_type=jnp.float32)
    out_ref[...] = (wa_ref[...].astype(jnp.float32) + d).astype(out_ref.dtype)


def _latent_triple_kernel(wa_ref, a_tgt_ref, a_src_ref, a_start_ref, qT_ref,
                          out_ref):
    # Linearity: (a_tgt - a_start + a_src) @ Q^T == d_tgt - d_start + d_src.
    # One (B, K) VPU combine + a single MXU matmul instead of three matmuls.
    a_comb = (a_tgt_ref[...].astype(jnp.float32)
              - a_start_ref[...].astype(jnp.float32)
              + a_src_ref[...].astype(jnp.float32))
    d = jnp.dot(a_comb, qT_ref[...].astype(jnp.float32),
                preferred_element_type=jnp.float32)
    out_ref[...] = (wa_ref[...].astype(jnp.float32) + d).astype(out_ref.dtype)


# --------------------------- pallas_call wrappers ---------------------------

def _round_up(x, m):
    return (x + m - 1) // m * m


def _pick_tile_b(bs):
    # Tiny batch: a single block (block second-last dim == full array dim
    # satisfies the (8,128) rule even when bs is not a multiple of 8).
    if bs <= 8:
        return bs
    # Otherwise: multiple-of-8 tile, capped at MAX_TILE_B, and sized so the
    # grid has >= 2 steps -> both v7x TensorCores stream under
    # dimension_semantics=("parallel",).  Larger batches get more steps and
    # BlockSpec double-buffering hides the DMA.
    return min(MAX_TILE_B, _round_up(pl.cdiv(bs, 2), 8))


def _latent_pallas(kernel, wa, alphas, qT):
    bs, style = wa.shape
    k = qT.shape[0]
    tb = _pick_tile_b(bs)
    grid = (pl.cdiv(bs, tb),)

    wa_spec = pl.BlockSpec((tb, style), lambda i: (i, 0))
    alpha_spec = pl.BlockSpec((tb, k), lambda i: (i, 0))
    qT_spec = pl.BlockSpec((k, style), lambda i: (0, 0))  # resident across grid

    itemsize = jnp.dtype(wa.dtype).itemsize
    a_itemsize = jnp.dtype(alphas[0].dtype).itemsize
    cost = pl.CostEstimate(
        flops=2 * bs * k * style,                               # one matmul
        transcendentals=0,
        bytes_accessed=(2 * bs * style * itemsize                # wa + out
                        + len(alphas) * bs * k * a_itemsize      # alphas
                        + k * style * jnp.dtype(qT.dtype).itemsize),
    )

    return pl.pallas_call(
        kernel,
        out_shape=jax.ShapeDtypeStruct((bs, style), wa.dtype),
        grid_spec=pltpu.PrefetchScalarGridSpec(
            num_scalar_prefetch=0,
            grid=grid,
            in_specs=[wa_spec] + [alpha_spec] * len(alphas) + [qT_spec],
            out_specs=pl.BlockSpec((tb, style), lambda i: (i, 0)),
        ),
        compiler_params=pltpu.CompilerParams(
            dimension_semantics=("parallel",)),
        cost_estimate=cost,
    )(wa, *alphas, qT)


def _latent_single(wa, alpha0, qT):
    return _latent_pallas(_latent_single_kernel, wa, [alpha0], qT)


def _latent_triple(wa, a_target, a_source, a_start, qT):
    return _latent_pallas(_latent_triple_kernel, wa,
                          [a_target, a_source, a_start], qT)


# ----------------------------- module wrappers ------------------------------

class Direction:
    """JAX port of Direction(nn.Module) with a cached orthonormal basis."""

    def __init__(self, motion_dim, key):
        # nn.Parameter(torch.randn(512, motion_dim)) -> deterministic init here
        self.weight = jax.random.normal(key, (STYLE_DIM, motion_dim),
                                        dtype=jnp.float32)
        self._q = None

    def orthonormal_basis(self):
        # TODO(synk): QR decomposition has no clean Pallas equivalent; it is
        # parameter preprocessing, computed once with jnp.linalg.qr and cached.
        # (jnp/torch QR column signs may differ; a sign fixup would be needed
        # to match a specific PyTorch checkpoint bit-for-bit.)
        if self._q is None:
            w = self.weight + 1e-08
            q, _ = jnp.linalg.qr(w.astype(jnp.float32))  # (512, motion_dim)
            self._q = q
        return self._q


class Synthesis:
    """JAX/Pallas port of Synthesis(nn.Module).forward."""

    def __init__(self, size, style_dim, motion_dim, key,
                 blur_kernel=(1, 3, 3, 1), channel_multiplier=1):
        self.size = size
        self.style_dim = style_dim
        self.motion_dim = motion_dim
        self.direction = Direction(motion_dim, key)
        # Hoist QR + transpose out of the forward: Q^T built once, kept in f32
        # (kernel upcasts refs to f32, so no per-call convert is needed).
        self.qT = jnp.asarray(self.direction.orthonormal_basis().T)  # (K, 512)

    def __call__(self, wa, alpha, feats, *, force_pallas=False):
        if alpha is None:
            return wa
        bs = wa.shape[0]
        use_pallas = force_pallas or bs >= PALLAS_MIN_BATCH

        if len(alpha) > 1:
            if len(alpha) < 3:
                raise ValueError(
                    "multi-alpha path requires 3 entries "
                    "(target, source, start); got %d" % len(alpha))
            if use_pallas:
                # latent = wa + (d_target - d_start) + d_source
                return _latent_triple(wa, alpha[0], alpha[1], alpha[2], self.qT)
            a_comb = (alpha[0].astype(jnp.float32)
                      - alpha[2].astype(jnp.float32)
                      + alpha[1].astype(jnp.float32))
            return (wa.astype(jnp.float32) + a_comb @ self.qT).astype(wa.dtype)

        if use_pallas:
            return _latent_single(wa, alpha[0], self.qT)
        return (wa.astype(jnp.float32)
                + alpha[0].astype(jnp.float32) @ self.qT).astype(wa.dtype)


# --------------------------------- demo -------------------------------------

if __name__ == "__main__":
    key = jax.random.PRNGKey(0)
    k_w, k_wa, k_a0, k_a1, k_a2 = jax.random.split(key, 5)

    motion_dim = 16
    size = 256
    model = Synthesis(size=size, style_dim=STYLE_DIM, motion_dim=motion_dim,
                      key=k_w)
    q = model.direction.orthonormal_basis()

    def run_case(bs):
        wa = jax.random.normal(k_wa, (bs, STYLE_DIM), dtype=jnp.float32)
        alpha = [
            jax.random.normal(k_a0, (bs, motion_dim), dtype=jnp.float32),
            jax.random.normal(k_a1, (bs, motion_dim), dtype=jnp.float32),
            jax.random.normal(k_a2, (bs, motion_dim), dtype=jnp.float32),
        ]
        feats = None  # unused by Synthesis.forward

        # Pallas kernel paths (forced so the kernel runs even at tiny batch).
        latent3 = jax.block_until_ready(
            model(wa, alpha, feats, force_pallas=True))
        latent1 = jax.block_until_ready(
            model(wa, alpha[:1], feats, force_pallas=True))
        # Default dispatch (XLA at tiny batch) and alpha=None passthrough.
        latent3_default = jax.block_until_ready(model(wa, alpha, feats))
        latent0 = jax.block_until_ready(model(wa, None, feats))

        # pure-JAX reference:
        # sum(diag_embed(alpha) @ Q.T, dim=1) == alpha @ Q.T
        ref3 = wa + (alpha[0] @ q.T - alpha[2] @ q.T) + alpha[1] @ q.T
        ref1 = wa + alpha[0] @ q.T

        assert latent3.shape == (bs, STYLE_DIM)
        assert jnp.allclose(latent3, ref3, rtol=1e-4, atol=1e-4)
        assert jnp.allclose(latent1, ref1, rtol=1e-4, atol=1e-4)
        assert jnp.allclose(latent3_default, ref3, rtol=1e-4, atol=1e-4)
        assert jnp.allclose(latent0, wa)

    run_case(bs=2)    # single-block path (grid = 1)
    run_case(bs=16)   # tiled path (tb = 8, grid = 2 -> v7x both-core case)

    print("KERNEL_OK")
</pallas_src>

<mosaic_0001>
module attributes {stable_mosaic.version = 11 : i64} {
  func.func @_latent_triple_kernel(%arg0: i32, %arg1: memref<2x512xf32, #tpu.memory_space<vmem>>, %arg2: memref<2x16xf32, #tpu.memory_space<vmem>>, %arg3: memref<2x16xf32, #tpu.memory_space<vmem>>, %arg4: memref<2x16xf32, #tpu.memory_space<vmem>>, %arg5: memref<16x512xf32, #tpu.memory_space<vmem>>, %arg6: memref<2x512xf32, #tpu.memory_space<vmem>>) attributes {dimension_semantics = [#tpu.dimension_semantics<parallel>], iteration_bounds = array<i64: 1>, scalar_prefetch = 0 : i64, scratch_operands = 0 : i64, tpu.core_type = #tpu.core_type<tc>, window_params = [{transform_indices = @transform_0, window_bounds = array<i64: 2, 512>}, {transform_indices = @transform_1, window_bounds = array<i64: 2, 16>}, {transform_indices = @transform_2, window_bounds = array<i64: 2, 16>}, {transform_indices = @transform_3, window_bounds = array<i64: 2, 16>}, {pipeline_mode = #tpu.pipeline_mode<synchronous>, transform_indices = @transform_4, window_bounds = array<i64: 16, 512>}, {transform_indices = @transform_5, window_bounds = array<i64: 2, 512>}]} {
    %c0 = arith.constant 0 : index
    %c0_0 = arith.constant 0 : index
    %0 = vector.load %arg2[%c0, %c0_0] : memref<2x16xf32, #tpu.memory_space<vmem>>, vector<2x16xf32>
    %c0_1 = arith.constant 0 : index
    %c0_2 = arith.constant 0 : index
    %1 = vector.load %arg4[%c0_1, %c0_2] : memref<2x16xf32, #tpu.memory_space<vmem>>, vector<2x16xf32>
    %2 = arith.subf %0, %1 : vector<2x16xf32>
    %c0_3 = arith.constant 0 : index
    %c0_4 = arith.constant 0 : index
    %3 = vector.load %arg3[%c0_3, %c0_4] : memref<2x16xf32, #tpu.memory_space<vmem>>, vector<2x16xf32>
    %4 = arith.addf %2, %3 : vector<2x16xf32>
    %c0_5 = arith.constant 0 : index
    %c0_6 = arith.constant 0 : index
    %5 = vector.load %arg5[%c0_5, %c0_6] : memref<16x512xf32, #tpu.memory_space<vmem>>, vector<16x512xf32>
    %cst = arith.constant dense<0.000000e+00> : vector<2x512xf32>
    %6 = tpu.matmul %4, %5, %cst {dimension_numbers = #tpu.dot_dimension_numbers<[1], [0], [0], [1], [0, 0, 1, 1], [], []>} : vector<2x16xf32>, vector<16x512xf32>, vector<2x512xf32> -> vector<2x512xf32>
    %c0_7 = arith.constant 0 : index
    %c0_8 = arith.constant 0 : index
    %7 = vector.load %arg1[%c0_7, %c0_8] : memref<2x512xf32, #tpu.memory_space<vmem>>, vector<2x512xf32>
    %8 = arith.addf %7, %6 : vector<2x512xf32>
    %c0_9 = arith.constant 0 : index
    %c0_10 = arith.constant 0 : index
    %9 = vector.load %arg6[%c0_9, %c0_10] : memref<2x512xf32, #tpu.memory_space<vmem>>, vector<2x512xf32>
    tpu.vector_store %arg6[%c0_9, %c0_10], %8 {strides = array<i32>} : memref<2x512xf32, #tpu.memory_space<vmem>>, vector<2x512xf32>,
    return
  }
  func.func @transform_0(%arg0: i32) -> (i32, i32) {
    %c0_i32 = arith.constant 0 : i32
    %c0_i32_0 = arith.constant 0 : i32
    return %arg0, %c0_i32 : i32, i32
  }
  func.func @transform_1(%arg0: i32) -> (i32, i32) {
    %c0_i32 = arith.constant 0 : i32
    %c0_i32_0 = arith.constant 0 : i32
    return %arg0, %c0_i32 : i32, i32
  }
  func.func @transform_2(%arg0: i32) -> (i32, i32) {
    %c0_i32 = arith.constant 0 : i32
    %c0_i32_0 = arith.constant 0 : i32
    return %arg0, %c0_i32 : i32, i32
  }
  func.func @transform_3(%arg0: i32) -> (i32, i32) {
    %c0_i32 = arith.constant 0 : i32
    %c0_i32_0 = arith.constant 0 : i32
    return %arg0, %c0_i32 : i32, i32
  }
  func.func @transform_4(%arg0: i32) -> (i32, i32) {
    %c0_i32 = arith.constant 0 : i32
    %c0_i32_0 = arith.constant 0 : i32
    %c0_i32_1 = arith.constant 0 : i32
    return %c0_i32, %c0_i32_0 : i32, i32
  }
  func.func @transform_5(%arg0: i32) -> (i32, i32) {
    %c0_i32 = arith.constant 0 : i32
    %c0_i32_0 = arith.constant 0 : i32
    return %arg0, %c0_i32 : i32, i32
  }
}

</mosaic_0001>

<bundles_post_ra>
// kernel: tpu_custom_call.1
= control target key start
LH: loop header
LB: loop body
LE: loop exit
PB: predicated region body
PF: predicated region fallthrough
CT: control target
= control target key end

     0   :  { %10 = vsyncpa [#allocation3], 0  ;;  %s425_s0 = inlined_call_operand.hbm [shape: f32[2,512], index: 0, kind: input, shape index: {}]   ;;  %s426_s1 = inlined_call_operand.vmem [shape: f32[2,16], index: 1, kind: input, shape index: {}]   ;;  %s427_s2 = inlined_call_operand.vmem [shape: f32[2,16], index: 2, kind: input, shape index: {}]   ;;  %s428_s3 = inlined_call_operand.vmem [shape: f32[2,16], index: 3, kind: input, shape index: {}]   ;;  %s429_s4 = inlined_call_operand.hbm [shape: f32[16,512], index: 4, kind: input, shape index: {}]   ;;  %s430_s5 = inlined_call_operand.hbm [shape: f32[2,512], index: 5, kind: output, shape index: {}]  }
   0x1   :  { %11 = vsyncpa [#allocation6], 0 }
   0x2   :  { %12 = vsyncpa [#allocation4], 0  ;;  %s336_s18 = smov [#allocation2]   ;;  %s337_s20 = smov [#allocation5]  }
   0x3   :  { %s19_s19 = sshll.u32 %s336_s18, 4  ;;  %s34_s21 = sshll.u32 %s337_s20, 4  ;;  %s20_s19 = int_to_ptr.vmem [resolvable:$true] %s19_s19  ;;  %s373_s21 = int_to_ptr.vmem [resolvable:$true] %s34_s21 }
   0x4   :  { %s264_s24 = scalar_lea.hbm %s425_s0, 128 }
   0x5   :  { %p265_p0 = scmp.ne.s32.totalorder %s425_s0, %s264_s24  ;;  %p268_p1 = scmp.lt.u32.totalorder %s264_s24, %s425_s0 }
   0x7   :  { %p270_p2 = pnand %p268_p1, %p265_p0 }
   0x9   :  { %273 = shalt.err (!%p270_p2)
}
   0xa   :  { %s274_s29 = scalar_lea.vmem %s20_s19, 128  ;;  %p279_p4 = scmp.lt.s32.totalorder %s20_s19, %s20_s19 }
   0xb   :  { %p275_p3 = scmp.ne.s32.totalorder %s20_s19, %s274_s29  ;;  %p280_p5 = scmp.lt.s32.totalorder %s274_s29, %s274_s29 }
   0xd   :  { %p281_p6 = por %p280_p5, %p279_p4 }
   0xf   :  { %p282_p7 = pnand %p281_p6, %p275_p3 }
  0x11   :  { %285 = shalt.err (!%p282_p7)
}
  0x12   :  { %22 = dma.hbm_to_vmem [thread:$0]  %s425_s0, 128, %s20_s19, [#allocation3]  }
  0x13   :  { %s286_s9 = scalar_lea.hbm %s429_s4, 1024 }
  0x14   :  { %p287_p8 = scmp.ne.s32.totalorder %s429_s4, %s286_s9  ;;  %p290_p9 = scmp.lt.u32.totalorder %s286_s9, %s429_s4 }
  0x16   :  { %p292_p10 = pnand %p290_p9, %p287_p8 }
  0x18   :  { %295 = shalt.err (!%p292_p10)
}
  0x19   :  { %s296_s14 = scalar_lea.vmem %s373_s21, 1024  ;;  %p301_p12 = scmp.lt.s32.totalorder %s373_s21, %s373_s21 }
  0x1a   :  { %p297_p11 = scmp.ne.s32.totalorder %s373_s21, %s296_s14  ;;  %p302_p13 = scmp.lt.s32.totalorder %s296_s14, %s296_s14 }
  0x1c   :  { %p303_p0 = por %p302_p13, %p301_p12 }
  0x1e   :  { %p304_p1 = pnand %p303_p0, %p297_p11 }
  0x20   :  { %307 = shalt.err (!%p304_p1)
}
  0x21   :  { %s338_s0 = smov 512   ;;  %s339_s15 = smov 32  }
  0x22   :  { %40 = dma.hbm_to_vmem [thread:$0]  %s429_s4, 1024, %s373_s21, [#allocation6], %s338_s0, %s338_s0, %s339_s15  }
  0x23   :  { %330 = dma.done.wait [#allocation3], 128  }
  0x24   :  { %331 = vsyncadd [#allocation3], 4294967168 }
  0x25   :  { %332 = dma.done.wait [#allocation6], 1024  }
  0x26   :  { %333 = vsyncadd [#allocation6], 4294966272  ;;  %v340_v0 = vmov 0.0   ;;  %v53_v1 = vld [vmem:[#allocation5 + $0x8] sm:$0xff]  ;;  %v55_v3 = vld [vmem:[#allocation5 + $0x18] sm:$0xff]  ;;  %vm60_vm0 = vcmask 130048   ;;  %v216_v20 = vlaneseq }
  0x27   :  { %128 = vmatprep.mubr.f32.mxu0 %v340_v0  ;;  %199 = vmatprep.mubr.f32.mxu1 %v340_v0  ;;  %v57_v2 = vld [vmem:[#allocation5 + $0x28] sm:$0xff]  ;;  %v59_v5 = vld [vmem:[#allocation5 + $0x38] sm:$0xff]  ;;  %v52_v6 = vld [vmem:[#allocation5] sm:$0xff]  ;;  %v341_v18 = vmov 1983009808  }
  0x28   :  { %v249_v4 = vpack.c.bf16 %v57_v2, %v53_v1  ;;  %v56_v7 = vld [vmem:[#allocation5 + $0x20] sm:$0xff]  ;;  %v253_v8 = vpack.c.bf16 %v59_v5, %v55_v3  ;;  %v54_v10 = vld [vmem:[#allocation5 + $0x10] sm:$0xff]  ;;  %v47_v12 = vld [vmem:[%s426_s1] sm:$0x3]  ;;  %v214_v19 = vunpack.c.l.s4 %v341_v18  ;;  %v217_v22 = vshrl.u32 %v216_v20, 7  ;;  %s342_s1 = smov [#allocation7]  }
  0x29   :  { %v251_v9 = vpack.c.bf16 %v56_v7, %v52_v6  ;;  %v58_v11 = vld [vmem:[#allocation5 + $0x30] sm:$0xff]  ;;  %v48_v14 = vld [vmem:[%s428_s3] sm:$0x3] }
  0x2a   :  { %250 = vmatprep.subr.bf16.mxu0 %v249_v4  ;;  %v255_v13 = vpack.c.bf16 %v58_v11, %v54_v10  ;;  %v50_v15 = vld [vmem:[%s427_s2] sm:$0x3]  ;;  %254 = vmatprep.subr.bf16.mxu1 %v253_v8  ;;  %v49_v16 = vsub.f32 %v47_v12, %v48_v14  ;;  %v215_v21 = vunpack.c.0.s8 %v214_v19  ;;  %s237_s2 = sshll.u32 %s342_s1, 4  ;;  %s238_s2 = int_to_ptr.vmem [resolvable:$true] %s237_s2 }
  0x2b   :  { %252 = vmatpush1.bf16.msra.mxu0 %v251_v9  ;;  %v206_v32 = vld [vmem:[#allocation2] sm:$0xff]  ;;  %s308_s3 = scalar_lea.vmem %s238_s2, 128  ;;  %p313_p3 = scmp.lt.s32.totalorder %s238_s2, %s238_s2 }
  0x2c   :  { %256 = vmatpush1.bf16.msra.mxu1 %v255_v13  ;;  %v51_v17 = vadd.f32 %v50_v15, %v49_v16  ;;  %v218_v25 = vsub.s32 %v215_v21, %v217_v22  ;;  %p309_p2 = scmp.ne.s32.totalorder %s238_s2, %s308_s3  ;;  %p314_p4 = scmp.lt.s32.totalorder %s308_s3, %s308_s3 }
  0x2e   :  { %247 = vmatmul.mubr.msk.f32.vlgmr.msra.gmra.mrb[0].mxu0 %vm60_vm0, %v51_v17  ;;  %p315_p5 = por %p314_p4, %p313_p3 }
  0x2f   :  { %248 = vmatmul.mubr.msk.f32.vlgmr.msra.gmra.mrb[0].mxu1 %vm60_vm0, %v51_v17 }
  0x30   :  { %p316_p6 = pnand %p315_p5, %p309_p2 }
 0x101   :  { %v130_v23 = vpop.f32.mrb[0].mxu0 }
 0x102   :  { %v201_v24 = vpop.f32.mrb[0].mxu1  ;;  %v132_v26 = vpop.f32.mrb[1].mxu0 }
 0x103   :  { %v203_v27 = vpop.f32.mrb[1].mxu1  ;;  %v211_v28 = vcombine.low %v130_v23, %v132_v26 }
 0x104   :  { %v212_v29 = vcombine.low %v201_v24, %v203_v27 }
 0x105   :  { %v219_v30 = vrot.slane %v211_v28, %v218_v25 }
 0x106   :  { %v226_v31 = vrot.slane %v212_v29, %v218_v25 }
 0x108   :  { %v227_v33 = vcombine.low %v219_v30, %v226_v31 }
 0x10a   :  { %v229_v34 = vadd.f32 %v227_v33, %v206_v32 }
 0x10c   :  { %230 = vst [vmem:[#allocation7] sm:$0xff] %v229_v34 }
 0x10d   :  { %319 = shalt.err (!%p316_p6)
}
 0x10e   :  { %s320_s25 = scalar_lea.hbm %s430_s5, 128 }
 0x10f   :  { %p321_p7 = scmp.ne.s32.totalorder %s430_s5, %s320_s25  ;;  %p324_p8 = scmp.lt.u32.totalorder %s320_s25, %s430_s5 }
 0x111   :  { %p326_p9 = pnand %p324_p8, %p321_p7 }
 0x113   :  { %329 = shalt.err (!%p326_p9)
}
 0x114   :  { %240 = dma.vmem_to_hbm [thread:$0]  %s238_s2, 128, %s430_s5, [#allocation4]  }
 0x115   :  { %334 = dma.done.wait [#allocation4], 128  }
 0x116   :  { %335 = vsyncadd [#allocation4], 4294967168 }
 0x117   :  { %244 = vsyncpa [#allocation3], 1 }
 0x118   :  { %245 = vsyncpa [#allocation6], 1 }
 0x119   :  { %246 = vsyncpa [#allocation4], 1 }

</bundles_post_ra>
